<compile_context>
chip_gen: v7x
topology: tpu7x:2x2x1
jax: 0.10.0
libtpu: 0.0.40
codegen_flags: <defaults>
</compile_context>

<pallas_src>
import jax
import jax.numpy as jnp
from jax.experimental import pallas as pl
from jax.experimental.pallas import tpu as pltpu


def _round_up(x, m):
    return ((x + m - 1) // m) * m


def _round_down(x, m):
    return (x // m) * m


def _vmem_capacity_bytes():
    try:
        return int(pltpu.get_tpu_info().vmem_capacity_bytes)
    except Exception:
        return 64 * 1024 * 1024  # conservative fallback (v7x per-TC VMEM)


def _outconv_kernel(x_ref, w_ref, b_ref, o_ref):
    # x_ref: (bn, C_in, tile)   activations, lane-dense on flattened H*W
    # w_ref: (co_t, C_in)       1x1-conv weight tile
    # b_ref: (co_t, 1)          bias column (f32), broadcasts across lanes
    # o_ref: (bn, co_t, tile)   lane-dense output tile
    w = w_ref[...]
    b = b_ref[...]
    for i in range(x_ref.shape[0]):  # static, small (<= 8 images per step)
        acc = jnp.dot(w, x_ref[i], preferred_element_type=jnp.float32)
        o_ref[i] = (acc + b).astype(o_ref.dtype)


def outconv_forward(x_nchw, weight, bias):
    """1x1 conv forward (PyTorch nn.Conv2d(in_ch, out_ch, 1) semantics).

    x_nchw: (N, C_in, H, W)
    weight: (C_out, C_in, 1, 1)   (PyTorch Conv2d layout)
    bias:   (C_out,)
    returns (N, C_out, H, W) with x's dtype (accumulation in f32).
    """
    N, C_in, H, W = x_nchw.shape
    C_out = weight.shape[0]
    HW = H * W
    db = jnp.dtype(x_nchw.dtype).itemsize

    x = x_nchw.reshape(N, C_in, HW)
    w = weight.reshape(C_out, C_in).astype(x.dtype)
    b = bias.reshape(C_out, 1).astype(jnp.float32)

    # --- C_out tiling: keep the (double-buffered) weight block bounded. ---
    co_t = C_out if C_out <= 256 else 256
    co_tiles = pl.cdiv(C_out, co_t)
    # TODO(synk): for very large C_in also tile K as a trailing "arbitrary"
    # grid axis with an f32 VMEM accumulator; a single (co_t, C_in) weight
    # block is fine for typical outconv channel counts.

    # --- VMEM-aware lane-tile sizing (kernel is pure HBM-bandwidth-bound). ---
    vmem_cap = _vmem_capacity_bytes()
    budget = int(vmem_cap * 0.35)                      # headroom for dbl-buffering
    lane_cap = budget // (4 * (C_in + co_t) * db)
    lane_cap = max(512, min(32768, lane_cap))
    lane_cap = max(128, _round_down(lane_cap, 128))

    hw_r = _round_up(HW, 128)
    tile = min(lane_cap, hw_r)

    # --- batch grouping when one image's HW does not fill the lane budget. ---
    bn = 1
    if tile == hw_r and N > 1:
        for cand in range(min(N, 8), 1, -1):
            if N % cand:
                continue
            if cand * hw_r > lane_cap:
                continue
            if (N // cand) * co_tiles * pl.cdiv(HW, tile) < 2:
                continue  # keep >=2 grid steps so v7x megacore stays busy
            bn = cand
            break

    # Keep at least 2 grid steps when possible (v7x has 2 TensorCores).
    while (N // bn) * co_tiles * pl.cdiv(HW, tile) < 2 and tile > 128:
        tile = max(128, _round_down(tile // 2, 128))

    grid = (N // bn, co_tiles, pl.cdiv(HW, tile))

    # Explicit scoped-VMEM limit with headroom (v5e default is only 16 MiB).
    block_bytes = 2 * bn * (C_in + co_t) * tile * db       # dbl-buffered x + out
    weight_bytes = 2 * (co_t * C_in * db + co_t * 4)       # dbl-buffered w + b
    est = block_bytes + weight_bytes
    vmem_limit = int(max(est * 1.25 + (2 << 20), 16 << 20))
    vmem_limit = int(min(vmem_limit, int(vmem_cap * 0.85)))
    vmem_limit = int(max(vmem_limit, est + (1 << 20)))

    out = pl.pallas_call(
        _outconv_kernel,
        out_shape=jax.ShapeDtypeStruct((N, C_out, HW), x.dtype),
        grid_spec=pltpu.PrefetchScalarGridSpec(
            num_scalar_prefetch=0,
            grid=grid,
            in_specs=[
                # activations: (bn, C_in, tile) per step
                pl.BlockSpec((bn, C_in, tile), lambda n, co, hw: (n, 0, hw)),
                # weights / bias: constant across (n, hw) -> stay resident
                pl.BlockSpec((co_t, C_in), lambda n, co, hw: (co, 0)),
                pl.BlockSpec((co_t, 1), lambda n, co, hw: (co, 0)),
            ],
            out_specs=pl.BlockSpec((bn, co_t, tile),
                                   lambda n, co, hw: (n, co, hw)),
        ),
        compiler_params=pltpu.CompilerParams(
            dimension_semantics=("parallel", "parallel", "parallel"),
            vmem_limit_bytes=vmem_limit),
    )(x, w, b)

    return out.reshape(N, C_out, H, W)


if __name__ == "__main__":
    key = jax.random.PRNGKey(0)
    k_x, k_w, k_b = jax.random.split(key, 3)

    N, C_in, H, W = 2, 4, 16, 16
    C_out = 3

    x = jax.random.normal(k_x, (N, C_in, H, W), dtype=jnp.float32)
    # Deterministic synthetic parameters (PyTorch Conv2d(in_ch, out_ch, 1) shapes).
    weight = jax.random.normal(k_w, (C_out, C_in, 1, 1), dtype=jnp.float32) * 0.1
    bias = jax.random.normal(k_b, (C_out,), dtype=jnp.float32) * 0.1

    y = jax.block_until_ready(outconv_forward(x, weight, bias))

    ref = jnp.einsum("nchw,oc->nohw", x, weight.reshape(C_out, C_in)) \
        + bias.reshape(1, C_out, 1, 1)
    assert y.shape == (N, C_out, H, W)
    assert jnp.allclose(y, ref, atol=1e-5, rtol=1e-5)

    # Exercise the no-pad / partial-last-block path (HW not a multiple of 128).
    x2 = jax.random.normal(k_x, (1, C_in, 10, 10), dtype=jnp.float32)
    y2 = jax.block_until_ready(outconv_forward(x2, weight, bias))
    ref2 = jnp.einsum("nchw,oc->nohw", x2, weight.reshape(C_out, C_in)) \
        + bias.reshape(1, C_out, 1, 1)
    assert y2.shape == (1, C_out, 10, 10)
    assert jnp.allclose(y2, ref2, atol=1e-5, rtol=1e-5)

    print("KERNEL_OK")
</pallas_src>

<mosaic_0001>
module attributes {stable_mosaic.version = 11 : i64} {
  func.func @_outconv_kernel(%arg0: i32, %arg1: i32, %arg2: i32, %arg3: memref<1x4x256xf32, #tpu.memory_space<vmem>>, %arg4: memref<3x4xf32, #tpu.memory_space<vmem>>, %arg5: memref<3x1xf32, #tpu.memory_space<vmem>>, %arg6: memref<1x3x256xf32, #tpu.memory_space<vmem>>) attributes {dimension_semantics = [#tpu.dimension_semantics<parallel>, #tpu.dimension_semantics<parallel>, #tpu.dimension_semantics<parallel>], iteration_bounds = array<i64: 2, 1, 1>, scalar_prefetch = 0 : i64, scratch_operands = 0 : i64, tpu.core_type = #tpu.core_type<tc>, window_params = [{transform_indices = @transform_0, window_bounds = array<i64: 1, 4, 256>}, {transform_indices = @transform_1, window_bounds = array<i64: 3, 4>}, {transform_indices = @transform_2, window_bounds = array<i64: 3, 1>}, {transform_indices = @transform_3, window_bounds = array<i64: 1, 3, 256>}]} {
    %c0 = arith.constant 0 : index
    %c0_0 = arith.constant 0 : index
    %0 = vector.load %arg4[%c0, %c0_0] : memref<3x4xf32, #tpu.memory_space<vmem>>, vector<3x4xf32>
    %c0_1 = arith.constant 0 : index
    %c0_2 = arith.constant 0 : index
    %1 = vector.load %arg5[%c0_1, %c0_2] : memref<3x1xf32, #tpu.memory_space<vmem>>, vector<3x1xf32>
    %c0_3 = arith.constant 0 : index
    %c0_4 = arith.constant 0 : index
    %c0_5 = arith.constant 0 : index
    %2 = vector.load %arg3[%c0_3, %c0_4, %c0_5] : memref<1x4x256xf32, #tpu.memory_space<vmem>>, vector<1x4x256xf32>
    %3 = vector.shape_cast %2 : vector<1x4x256xf32> to vector<4x256xf32>
    %cst = arith.constant dense<0.000000e+00> : vector<3x256xf32>
    %4 = tpu.matmul %0, %3, %cst {dimension_numbers = #tpu.dot_dimension_numbers<[1], [0], [0], [1], [0, 0, 1, 1], [], []>} : vector<3x4xf32>, vector<4x256xf32>, vector<3x256xf32> -> vector<3x256xf32>
    %5 = vector.broadcast %1 : vector<3x1xf32> to vector<3x256xf32>
    %6 = arith.addf %4, %5 : vector<3x256xf32>
    %c0_6 = arith.constant 0 : index
    %c0_7 = arith.constant 0 : index
    %c0_8 = arith.constant 0 : index
    %7 = vector.load %arg6[%c0_6, %c0_7, %c0_8] : memref<1x3x256xf32, #tpu.memory_space<vmem>>, vector<1x3x256xf32>
    %8 = vector.shape_cast %7 : vector<1x3x256xf32> to vector<3x256xf32>
    %9 = vector.shape_cast %6 : vector<3x256xf32> to vector<1x3x256xf32>
    tpu.vector_store %arg6[%c0_6, %c0_7, %c0_8], %9 {strides = array<i32>} : memref<1x3x256xf32, #tpu.memory_space<vmem>>, vector<1x3x256xf32>,
    return
  }
  func.func @transform_0(%arg0: i32, %arg1: i32, %arg2: i32) -> (i32, i32, i32) {
    %c0_i32 = arith.constant 0 : i32
    %c0_i32_0 = arith.constant 0 : i32
    return %arg0, %c0_i32, %arg2 : i32, i32, i32
  }
  func.func @transform_1(%arg0: i32, %arg1: i32, %arg2: i32) -> (i32, i32) {
    %c0_i32 = arith.constant 0 : i32
    %c0_i32_0 = arith.constant 0 : i32
    return %arg1, %c0_i32 : i32, i32
  }
  func.func @transform_2(%arg0: i32, %arg1: i32, %arg2: i32) -> (i32, i32) {
    %c0_i32 = arith.constant 0 : i32
    %c0_i32_0 = arith.constant 0 : i32
    return %arg1, %c0_i32 : i32, i32
  }
  func.func @transform_3(%arg0: i32, %arg1: i32, %arg2: i32) -> (i32, i32, i32) {
    %c0_i32 = arith.constant 0 : i32
    return %arg0, %arg1, %arg2 : i32, i32, i32
  }
}

</mosaic_0001>

<bundles_post_ra>
// kernel: tpu_custom_call.1
= control target key start
LH: loop header
LB: loop body
LE: loop exit
PB: predicated region body
PF: predicated region fallthrough
CT: control target
= control target key end

     0   :  { %8 = vsyncpa [#allocation3], 0  ;;  %s822_s0 = inlined_call_operand.hbm [shape: f32[2,4,256], index: 0, kind: input, shape index: {}]   ;;  %s823_s1 = inlined_call_operand.vmem [shape: f32[3,4], index: 1, kind: input, shape index: {}]   ;;  %s824_s2 = inlined_call_operand.vmem [shape: f32[3,1], index: 2, kind: input, shape index: {}]   ;;  %s825_s3 = inlined_call_operand.vmem [shape: f32[2,3,256], index: 3, kind: output, shape index: {}]  }
   0x1   :  { %10 = vsyncpa [#allocation3 + $0x1], 0  ;;  %s691_s12 = smov 0   ;;  %s693_s13 = smov 0  }
   0x2   :  { %s695_s14 = smov 0   ;;  %s697_s15 = smov 0  }
   0x3   :  { %s699_s16 = smov 0   ;;  %s701_s17 = smov 0  }
   0x4 LB: > { %s507_s18 = sadd.s32 4294967295, %s666_s17   ;;  %s35_s19 = sadd.s32 1, %s662_s16  ;;  %s666_s17 = sphi %s701_s17, %s16_s17   ;;  %s662_s16 = sphi %s699_s16, %s835_s16   ;;  %s658_s15 = sphi %s697_s15, %s834_s15   ;;  %s654_s14 = sphi %s695_s14, %s833_s14   ;;  %s650_s13 = sphi %s693_s13, %s832_s13   ;;  %s646_s12 = sphi %s691_s12, %s831_s12  }
   0x5   : > { %p37_p0 = scmp.ge.s32.totalorder %s35_s19, 2  ;;  %s44_s20 = sadd.s32 1, %s654_s14 }
   0x6   : > { %p51_p1 = scmp.ne.s32.totalorder %s654_s14, %s650_s13  ;;  %p52_p2 = scmp.eq.s32.totalorder %s666_s17, 0 }
   0x7   : > { %s837_s19 = smov (%p37_p0, %s35_s19), 0  ;;  %p57_p4 = scmp.ne.s32.totalorder %s650_s13, %s646_s12 }
   0x8   : > { %p727_p3 = por %p52_p2, %p51_p1  ;;  %s39_s22 = ssub.s32 %s662_s16, %s837_s19 }
   0x9   : > { %p58_p5 = scmp.eq.s32.totalorder %s507_s18, 0  ;;  %p42_p6 = scmp.eq.s32.totalorder %s39_s22, 0 }
   0xa   : > { %p533_p8 = scmp.lt.s32.totalorder %s666_s17, 2  ;;  %s177_s25 = sand.u32 1, %s654_s14  }
   0xb   : > { %p734_p7 = por %p58_p5, %p57_p4  ;;  %s525_s26 = sshll.u32 %s662_s16, 7 }
   0xc   : > { %s740_s24 = scalar_select %p42_p6, %s654_s14, %s44_s20  }
   0xd   : > { %s513_s27 = sshll.u32 %s177_s25, 3  ;;  %s747_s30 = scalar_lea.hbm %s822_s0, %s525_s26 }
   0xe   : > { %s181_s4 = scalar_lea.vmem [#allocation2], %s513_s27  ;;  %p751_p9 = pnand %p533_p8, %p727_p3 }
   0xf   : > { %s191_s5 = sshll.u32 %s181_s4, 4  ;;  %s178_s7 = scalar_lea.sflag [#allocation3], %s177_s25  ;;  %s755_s5 = int_to_ptr.vmem [resolvable:$true] %s191_s5 }
  0x10   : > { %s586_s8 = scalar_lea.hbm %s747_s30, 128  ;;  %p588_p13 = pneg %p751_p9 }
  0x11   : > { %p587_p12 = scmp.ne.s32.totalorder %s747_s30, %s586_s8  ;;  %s591_s11 = scalar_lea.hbm %s822_s0, 256 }
  0x12   : > { %p592_p2 = scmp.lt.u32.totalorder %s747_s30, %s822_s0  ;;  %p593_p3 = scmp.lt.u32.totalorder %s591_s11, %s586_s8 }
  0x13   : > { %p589_p0 = pnand %p588_p13, %p587_p12  ;;  %p595_p5 = scmp.lt.u32.totalorder %s586_s8, %s747_s30 }
  0x14   : > { %p594_p4 = por %p593_p3, %p592_p2 }
  0x15   : > { %p590_p1 = pneg %p589_p0 }
  0x16   : > { %p596_p6 = por %p595_p5, %p594_p4 }
  0x18   : > { %p597_p8 = pnand %p596_p6, %p590_p1 }
  0x1a   : > { %600 = shalt.err (!%p597_p8)
}
  0x1b   : > { %s601_s20 = scalar_lea.vmem %s755_s5, 128  ;;  %s668_s21 = smov [#allocation2]  }
  0x1c   : > { %p602_p12 = scmp.ne.s32.totalorder %s755_s5, %s601_s20  ;;  %s606_s22 = sshll.u32 %s668_s21, 4  ;;  %s607_s22 = int_to_ptr.vmem [resolvable:$false] %s606_s22 }
  0x1d   : > { %s608_s25 = scalar_lea.vmem %s607_s22, 256  ;;  %p609_p11 = scmp.lt.s32.totalorder %s755_s5, %s607_s22 }
  0x1e   : > { %p604_p0 = pnand %p602_p12, %p588_p13  ;;  %p610_p2 = scmp.lt.s32.totalorder %s608_s25, %s601_s20 }
  0x20   : > { %p605_p10 = pneg %p604_p0  ;;  %p611_p3 = por %p610_p2, %p609_p11 }
  0x22   : > { %p612_p4 = pnand %p611_p3, %p605_p10 }
  0x24   : > { %615 = shalt.err (!%p612_p4)
}
  0x25   : > { %532 = dma.hbm_to_vmem [thread:$0]  (!%p751_p9), %s747_s30, 128, %s755_s5, %s178_s7  }
  0x26   : > { %p829_p1 = scmp.lt.s32.totalorder %s666_s17, 3  ;;  %p830_p5 = scmp.ge.s32.totalorder %s666_s17, 1 }
  0x28   : > { %p197_p13 = pnand %p830_p5, %p829_p1 }
  0x29   : > { %s202_s26 = sand.u32 (!%p197_p13), 1, %s650_s13  }
  0x2a   : > { %200 = sbr.rel (%p197_p13) target bundleno = 273 (0x111), region = 32  ;;  %s517_s27 = sshll.u32 (!%p197_p13), %s202_s26, 3 }
  0x2b   : > { %s203_s28 = scalar_lea.sflag (!%p197_p13), [#allocation3], %s202_s26  ;;  %s206_s29 = scalar_lea.vmem (!%p197_p13), [#allocation2], %s517_s27 }
  0x31   : > { %641 = dma.done.wait (%p734_p7), %s203_s28, 128  }
  0x32   : > { %643 = vsyncadd (%p734_p7), %s203_s28, 4294967168  ;;  %v669_v0 = vmov 0.0   ;;  %v670_v1 = vmov 0   ;;  %v270_v2 = vld [vmem:[%s206_s29] sm:$0xff]  ;;  %vm282_vm0 = vcmask 1043456   ;;  %vm278_vm1 = vcmask 31744  }
  0x33   : > { %351 = vmatprep.mubr.f32.mxu0 %v669_v0  ;;  %584 = vset.pattern.permute.xlu0 %v670_v1  ;;  %v269_v3 = vld [vmem:[%s824_s2] sm:$0x7]  ;;  %v277_v4 = vcombine.high %v270_v2, %v270_v2  ;;  %p255_p7 = scmp.lt.s32.totalorder %s658_s15, 1 }
  0x34   : > { %273 = vperm.xlu0 %584, %v269_v3   ;;  %v268_v5 = vld [vmem:[%s823_s1] sm:$0x7] }
  0x35   : > { %520 = vmatprep.subr.msk.mxu0 %vm282_vm0, %v277_v4  ;;  %s839_s15 = smov (!%p255_p7, %s658_s15), 1 }
  0x36   : > { %521 = vmatpush1.msk.msra.mxu0 %vm282_vm0, %v270_v2  ;;  %s526_s23 = sshll.u32 %s839_s15, 3 }
  0x37   : > { %522 = vmatmul.mubr.msk.f32.vlgmr.msra.gmra.mrb[0].mxu0 %vm278_vm1, %v268_v5  ;;  %s266_s9 = scalar_lea.vmem %s825_s3, %s526_s23 }
  0xb3   : > { %v274_v6 = vpop.permute.xlu0 %273 }
 0x10a   : > { %v353_v7 = vpop.f32.mrb[0].mxu0 }
 0x10b   : > { %v354_v8 = vadd.f32 %v353_v7, %v274_v6  ;;  %v355_v9 = vpop.f32.mrb[1].mxu0 }
 0x10c   : > { %v356_v10 = vadd.f32 %v355_v9, %v274_v6 }
 0x10e   : > { %v360_v11 = vcombine.low %v354_v8, %v356_v10 }
 0x110   : > { %362 = vst [vmem:[%s266_s9] sm:$0x77] %v360_v11 }
 0x111 PF: > { %s16_s17 = sadd.s32 1, %s666_s17   ;;  %s831_s12 = smov %s650_s13 }
 0x112   : > { %p13_p9 = scmp.ge.s32.totalorder %s16_s17, 4   ;;  %s832_s13 = smov %s654_s14 }
 0x113   : > { %s833_s14 = smov %s740_s24  ;;  %s834_s15 = smov %s662_s16 }
 0x114   : > { %s835_s16 = smov %s837_s19  ;;  %15 = sbr.rel (!%p13_p9) target bundleno = 4 (0x4), region = 78 }
 0x11b   :  { %401 = vsyncpa [#allocation3], 1 }
 0x11c   :  { %403 = vsyncpa [#allocation3 + $0x1], 1 }

</bundles_post_ra>
